<compile_context>
chip_gen: v5e
topology: v5e:2x2
jax: 0.10.0
libtpu: 0.0.40
codegen_flags: <defaults>
</compile_context>

<pallas_src>
import functools

import jax
import jax.numpy as jnp
from jax.experimental import pallas as pl
from jax.experimental.pallas import tpu as pltpu


_COL_CANDIDATES = (1024, 512, 256, 128)
_TARGET_TILE_BYTES = 4 << 20     # per-buffer tile target
_SINGLE_TILE_BYTES = 512 << 10   # below this, a single tile is fine


def _round_up(n, m):
    return ((n + m - 1) // m) * m


def _pick_cols(total):
    """Largest lane-dense width dividing `total` (else 128 + an XLA tail)."""
    for c in _COL_CANDIDATES:
        if total % c == 0:
            return c
    return 128


def _choose_tile_rows(rows, cols, itemsize):
    """Big tiles, but >=2 (even count) tiles for non-tiny slabs so the
    'parallel' axis can be sharded across v7x's two TensorCores."""
    slab_bytes = rows * cols * itemsize
    if rows <= 8 or slab_bytes <= _SINGLE_TILE_BYTES:
        return rows  # genuinely small: one full-extent tile
    max_tile_rows = max(8, (_TARGET_TILE_BYTES // (cols * itemsize)) // 8 * 8)
    n_tiles = max(2, pl.cdiv(rows, max_tile_rows))
    if n_tiles % 2:
        n_tiles += 1  # even tile count -> balanced 2-TC load on v7x
    return min(max_tile_rows, _round_up(pl.cdiv(rows, n_tiles), 8))


# ---------------------------------------------------------------------------
# Kernels
# ---------------------------------------------------------------------------

def _elementwise_residual_kernel(fn, x_ref, o_ref):
    # Fused: read x once, compute fn(x) + x, write once. 2 HBM traversals.
    x = x_ref[...]
    o_ref[...] = (fn(x) + x).astype(o_ref.dtype)


def _add_residual_kernel(fx_ref, x_ref, o_ref):
    # General: fx already materialized by an arbitrary fn; just add.
    o_ref[...] = (fx_ref[...] + x_ref[...]).astype(o_ref.dtype)


def _run_tiled(kernel, ops_2d, out_dtype, *, alias_first=False):
    """Run `kernel` over a (rows, cols) lane-dense slab, tiled along rows."""
    rows, cols = ops_2d[0].shape
    itemsize = max([jnp.dtype(o.dtype).itemsize for o in ops_2d]
                   + [jnp.dtype(out_dtype).itemsize])
    tile_rows = _choose_tile_rows(rows, cols, itemsize)
    grid = (pl.cdiv(rows, tile_rows),)

    # Double-buffered VMEM need + headroom; explicit so v5e's 16 MiB scoped
    # default never bites, and well below v7x's 64 MiB physical VMEM.
    n_arrays = len(ops_2d) + 1
    vmem_need = n_arrays * 2 * tile_rows * cols * itemsize + (4 << 20)
    vmem_limit = int(min(max(vmem_need, 16 << 20), 48 << 20))

    spec = pl.BlockSpec((tile_rows, cols), lambda i: (i, 0))
    aliases = {0: 0} if (alias_first and ops_2d[0].dtype == out_dtype) else {}

    return pl.pallas_call(
        kernel,
        out_shape=jax.ShapeDtypeStruct((rows, cols), out_dtype),
        grid_spec=pl.GridSpec(
            grid=grid,
            in_specs=[spec] * len(ops_2d),
            out_specs=spec,
        ),
        input_output_aliases=aliases,
        compiler_params=pltpu.CompilerParams(
            dimension_semantics=("parallel",),
            vmem_limit_bytes=vmem_limit,
        ),
    )(*ops_2d)


# ---------------------------------------------------------------------------
# Residual wrappers
# ---------------------------------------------------------------------------

def _residual_fused_elementwise(x, fn):
    """fn is elementwise: fuse fn and the residual add in one streaming kernel."""
    fx_dtype = jax.eval_shape(fn, jax.ShapeDtypeStruct(x.shape, x.dtype)).dtype
    out_dtype = jnp.result_type(fx_dtype, x.dtype)
    orig_shape = x.shape
    total = x.size
    if total == 0:
        return jnp.zeros(orig_shape, out_dtype)

    xf = x.reshape(-1)
    cols = _pick_cols(total)
    main = (total // cols) * cols
    if main == 0:  # < 128 elements: not worth a kernel launch
        return (fn(x) + x).astype(out_dtype)

    rows = main // cols
    kernel = functools.partial(_elementwise_residual_kernel, fn)
    out = _run_tiled(kernel, [xf[:main].reshape(rows, cols)], out_dtype)
    out = out.reshape(-1)
    if main != total:  # ragged tail (< cols elems) via plain XLA — no pad copy
        tail = xf[main:]
        out = jnp.concatenate([out, (fn(tail) + tail).astype(out_dtype)])
    return out.reshape(orig_shape)


def _residual_add(fx, x):
    """General path: fx produced by an arbitrary fn; Pallas does fx + x,
    writing the output in place over fx's HBM buffer."""
    assert fx.shape == x.shape, (fx.shape, x.shape)
    out_dtype = jnp.result_type(fx.dtype, x.dtype)
    orig_shape = x.shape
    total = x.size
    if total == 0:
        return jnp.zeros(orig_shape, out_dtype)

    fxf = fx.reshape(-1)
    xf = x.reshape(-1)
    cols = _pick_cols(total)
    main = (total // cols) * cols
    if main == 0:
        return (fx + x).astype(out_dtype)

    rows = main // cols
    out = _run_tiled(
        _add_residual_kernel,
        [fxf[:main].reshape(rows, cols), xf[:main].reshape(rows, cols)],
        out_dtype,
        alias_first=True,  # fx is dead after the add -> in-place output
    )
    out = out.reshape(-1)
    if main != total:
        out = jnp.concatenate([out, (fxf[main:] + xf[main:]).astype(out_dtype)])
    return out.reshape(orig_shape)


def _identity(t):
    return t


def residual(x, fn=_identity, *args, fn_is_elementwise=None, **kwargs):
    """Residual forward: fn(x, *args, **kwargs) + x (matches the PyTorch module).

    fn_is_elementwise=True opts into the fused path (fn traced inside the
    Pallas kernel); default identity fn is fused automatically.
    """
    if fn_is_elementwise is None:
        fn_is_elementwise = fn is _identity
    if fn_is_elementwise and not args and not kwargs:
        return _residual_fused_elementwise(x, fn)
    # TODO(synk): non-elementwise wrapped modules (attention, conv blocks, ...)
    # are applied as plain JAX here; only the residual add runs in Pallas.
    fx = fn(x, *args, **kwargs)
    return _residual_add(fx, x)


def _reference_residual(x, fn=_identity, *args, **kwargs):
    return fn(x, *args, **kwargs) + x


if __name__ == "__main__":
    key = jax.random.PRNGKey(0)
    B, C, H, W = 2, 4, 16, 16
    x = jax.random.normal(key, (B, C, H, W), dtype=jnp.float32)

    # Case 1: identity fn (default) -> fused single-pass kernel, out == 2 * x.
    out = jax.block_until_ready(jax.jit(residual)(x))
    assert out.shape == (B, C, H, W)
    assert jnp.allclose(out, _reference_residual(x), atol=1e-6, rtol=1e-6)

    # Case 2: elementwise fn fused inside the kernel.
    fn2 = lambda t: jax.nn.gelu(t) * 0.5
    out2 = jax.block_until_ready(
        jax.jit(lambda a: residual(a, fn2, fn_is_elementwise=True))(x))
    assert jnp.allclose(out2, _reference_residual(x, fn2), atol=1e-5, rtol=1e-5)

    # Case 3: general path (fn treated as an opaque module): separate add
    # kernel with the output aliased over fx's buffer.
    out3 = jax.block_until_ready(
        jax.jit(lambda a: residual(a, fn2, fn_is_elementwise=False))(x))
    assert jnp.allclose(out3, _reference_residual(x, fn2), atol=1e-5, rtol=1e-5)

    # Case 4: ragged total (210 elements) -> prefix kernel + XLA tail, no pad copy.
    xr = jax.random.normal(jax.random.PRNGKey(1), (2, 3, 5, 7), dtype=jnp.float32)
    out4 = jax.block_until_ready(jax.jit(residual)(xr))
    assert jnp.allclose(out4, _reference_residual(xr), atol=1e-6, rtol=1e-6)

    # Case 5: larger slab (1 MiB) -> multi-tile grid (>=2 tiles, parallel axis).
    xl = jax.random.normal(jax.random.PRNGKey(2), (8, 8, 64, 64), dtype=jnp.float32)
    out5 = jax.block_until_ready(
        jax.jit(lambda a: residual(a, fn2, fn_is_elementwise=True))(xl))
    assert jnp.allclose(out5, _reference_residual(xl, fn2), atol=1e-5, rtol=1e-5)

    print("KERNEL_OK")
</pallas_src>

<mosaic_0001>
module attributes {stable_mosaic.version = 11 : i64} {
  func.func @_elementwise_residual_kernel(%arg0: i32, %arg1: memref<2x1024xf32, #tpu.memory_space<vmem>>, %arg2: memref<2x1024xf32, #tpu.memory_space<vmem>>) attributes {dimension_semantics = [#tpu.dimension_semantics<parallel>], iteration_bounds = array<i64: 1>, scalar_prefetch = 0 : i64, scratch_operands = 0 : i64, tpu.core_type = #tpu.core_type<tc>, window_params = [{transform_indices = @transform_0, window_bounds = array<i64: 2, 1024>}, {transform_indices = @transform_1, window_bounds = array<i64: 2, 1024>}]} {
    %c0 = arith.constant 0 : index
    %c0_0 = arith.constant 0 : index
    %0 = vector.load %arg1[%c0, %c0_0] : memref<2x1024xf32, #tpu.memory_space<vmem>>, vector<2x1024xf32>
    %1 = arith.addf %0, %0 : vector<2x1024xf32>
    %c0_1 = arith.constant 0 : index
    %c0_2 = arith.constant 0 : index
    %2 = vector.load %arg2[%c0_1, %c0_2] : memref<2x1024xf32, #tpu.memory_space<vmem>>, vector<2x1024xf32>
    tpu.vector_store %arg2[%c0_1, %c0_2], %1 {strides = array<i32>} : memref<2x1024xf32, #tpu.memory_space<vmem>>, vector<2x1024xf32>,
    return
  }
  func.func @transform_0(%arg0: i32) -> (i32, i32) {
    %c0_i32 = arith.constant 0 : i32
    %c0_i32_0 = arith.constant 0 : i32
    return %arg0, %c0_i32 : i32, i32
  }
  func.func @transform_1(%arg0: i32) -> (i32, i32) {
    %c0_i32 = arith.constant 0 : i32
    %c0_i32_0 = arith.constant 0 : i32
    return %arg0, %c0_i32 : i32, i32
  }
}

</mosaic_0001>

<bundles_post_ra>
// kernel: residual.1
= control target key start
LH: loop header
LB: loop body
LE: loop exit
PB: predicated region body
PF: predicated region fallthrough
CT: control target
= control target key end

     0   :  { %s40_s0 = inlined_call_operand.vmem [shape: f32[2,1024], index: 0, kind: input, shape index: {}]   ;;  %s41_s1 = inlined_call_operand.vmem [shape: f32[2,1024], index: 1, kind: output, shape index: {}]  }
   0x1   :  { %v8_v0 = vld [vmem:[%s40_s0] sm:$0xff]  ;;  %v9_v1 = vld [vmem:[%s40_s0 + $0x8] sm:$0xff] }
   0x2   :  { %v10_v2 = vadd.f32 %v8_v0, %v8_v0  ;;  %v11_v3 = vadd.f32 %v9_v1, %v9_v1 }
   0x4   :  { %12 = vst [vmem:[%s41_s1] sm:$0xff] %v10_v2 }
   0x5   :  { %13 = vst [vmem:[%s41_s1 + $0x8] sm:$0xff] %v11_v3 }

</bundles_post_ra>
